<compile_context>
chip_gen: v7x
topology: tpu7x:2x2x1
jax: 0.10.0
libtpu: 0.0.40
codegen_flags: <defaults>
</compile_context>

<pallas_src>
import functools

import jax
import jax.numpy as jnp
from jax.experimental import pallas as pl
from jax.experimental.pallas import tpu as pltpu


_LANES = 128
_VMEM_LIMIT_BYTES = 48 * 1024 * 1024
_MATMUL_PRECISION = None  # set to jax.lax.Precision.HIGHEST for strict fp32 parity


def _round_up(n, m):
    return ((n + m - 1) // m) * m


def _num_tensorcores():
    """Best-effort TensorCores-per-chip (v7x has 2); defaults to 1."""
    try:
        kind = (jax.devices()[0].device_kind or "").lower()
        if "v7" in kind:
            return 2
    except Exception:
        pass
    return 1


# ----------------------------- kernels -------------------------------------


def _mlp_fwd_kernel(x_ref, w1_ref, b1_ref, w2_ref, b2_ref, pred_ref):
    """pred = relu(x @ w1 + b1) @ w2 + b2 for one batch tile (inference path)."""
    h = jnp.dot(x_ref[...], w1_ref[...],
                preferred_element_type=jnp.float32, precision=_MATMUL_PRECISION)
    h = jnp.maximum(h + b1_ref[...], 0.0)
    p = jnp.dot(h, w2_ref[...],
                preferred_element_type=jnp.float32,
                precision=_MATMUL_PRECISION) + b2_ref[...]
    pred_ref[...] = p.astype(pred_ref.dtype)


def _mlp_fwd_loss_kernel(x_ref, w1_ref, b1_ref, w2_ref, b2_ref, y_ref,
                         pred_ref, loss_ref, *, true_rows):
    """Fused forward + cross-entropy partial sum for one batch tile.

    Emits a single per-tile loss sum broadcast across a full 128-lane row
    (lane-dense, unmasked store).  Rows at/after `true_rows` (ragged tail tile
    reading out-of-bounds garbage) are excluded via jnp.where, so NaN/Inf from
    garbage activations cannot pollute the sum.
    """
    h = jnp.dot(x_ref[...], w1_ref[...],
                preferred_element_type=jnp.float32, precision=_MATMUL_PRECISION)
    h = jnp.maximum(h + b1_ref[...], 0.0)
    logits = jnp.dot(h, w2_ref[...],
                     preferred_element_type=jnp.float32,
                     precision=_MATMUL_PRECISION) + b2_ref[...]      # (tb, C) f32
    pred_ref[...] = logits.astype(pred_ref.dtype)

    tb, c = logits.shape
    # numerically-stable log-sum-exp
    m = jnp.max(logits, axis=-1, keepdims=True)                      # (tb, 1)
    lse = m + jnp.log(jnp.sum(jnp.exp(logits - m), axis=-1, keepdims=True))
    # target logit via one-hot compare (labels assumed in [0, C))
    class_ids = jax.lax.broadcasted_iota(jnp.int32, (tb, c), dimension=1)
    y = y_ref[...]                                                   # (tb, 1) int32
    onehot = (class_ids == y).astype(jnp.float32)
    target_logit = jnp.sum(onehot * logits, axis=-1, keepdims=True)  # (tb, 1)

    row_ids = (pl.program_id(0) * tb
               + jax.lax.broadcasted_iota(jnp.int32, (tb, 1), dimension=0))
    per_ex = jnp.where(row_ids < true_rows, lse - target_logit, 0.0)  # (tb, 1)

    tile_sum = jnp.sum(per_ex, axis=0, keepdims=True)                 # (1, 1)
    loss_ref[...] = jnp.broadcast_to(tile_sum, (1, _LANES)).astype(loss_ref.dtype)


# ----------------------------- wrappers -------------------------------------


def _batch_tiling(batch, in_dim, out_dim, num_cores):
    """Pick (tile_rows, num_tiles) for the 1-D batch grid.

    The tile cap is derived from a VMEM budget (resident weights + double/
    triple-buffered x & pred tiles + f32 intermediates) so it stays under the
    explicit 48 MiB vmem_limit on every generation (v7x physical is 64 MiB/TC).
    On v7x (2 TensorCores) medium/large batches are split into >= 2 tiles so
    the "parallel" grid axis can be megacore-sharded.
    """
    b8 = _round_up(batch, 8)
    resident = 4 * (in_dim * 128 + 128 + 128 * out_dim + out_dim)
    # per-row VMEM: x (<=3 bufs) + pred (<=3 bufs) + h/logits/misc intermediates
    row_bytes = 4 * (3 * in_dim + 3 * out_dim + 3 * 128)
    avail = max(_VMEM_LIMIT_BYTES - resident - (8 << 20), 2 << 20)
    cap = max(8, min(2048, (avail // row_bytes) // 8 * 8))
    if b8 <= cap and (num_cores < 2 or b8 <= 256):
        # single block == exact array shape: no padding, no (8,128) constraints
        return batch, 1
    tb = min(cap, _round_up(pl.cdiv(b8, num_cores), 8))
    return tb, pl.cdiv(batch, tb)


@jax.jit
def mlp_apply(x, params, y=None):
    """Mirrors MLP.forward: returns pred, or (pred, loss) when y is given."""
    w1, b1, w2, b2 = params["w1"], params["b1"], params["w2"], params["b2"]
    batch, in_dim = x.shape
    hidden = w1.shape[1]
    out_dim = w2.shape[1]
    assert w1.shape == (in_dim, hidden) and w2.shape == (hidden, out_dim)

    num_cores = _num_tensorcores()
    tb, num_tiles = _batch_tiling(batch, in_dim, out_dim, num_cores)
    grid = (num_tiles,)

    b1_2d = b1.reshape(1, hidden)
    b2_2d = b2.reshape(1, out_dim)

    x_spec_kwargs = {}
    if num_tiles >= 4:
        # deeper pipeline on the only streamed large input (helps v5e HBM BW)
        x_spec_kwargs = dict(pipeline_mode=pl.Buffered(3))
    x_spec = pl.BlockSpec((tb, in_dim), lambda i: (i, 0), **x_spec_kwargs)
    w_specs = [
        pl.BlockSpec((in_dim, hidden), lambda i: (0, 0)),   # w1: resident
        pl.BlockSpec((1, hidden), lambda i: (0, 0)),        # b1: resident
        pl.BlockSpec((hidden, out_dim), lambda i: (0, 0)),  # w2: resident
        pl.BlockSpec((1, out_dim), lambda i: (0, 0)),       # b2: resident
    ]
    pred_spec = pl.BlockSpec((tb, out_dim), lambda i: (i, 0))
    cparams = pltpu.CompilerParams(
        dimension_semantics=("parallel",),
        vmem_limit_bytes=_VMEM_LIMIT_BYTES,
    )
    matmul_flops = 2 * batch * (in_dim * hidden + hidden * out_dim)
    param_bytes = 4 * (in_dim * hidden + hidden + hidden * out_dim + out_dim)

    if y is None:
        pred = pl.pallas_call(
            _mlp_fwd_kernel,
            out_shape=jax.ShapeDtypeStruct((batch, out_dim), jnp.float32),
            grid=grid,
            in_specs=[x_spec] + w_specs,
            out_specs=pred_spec,
            compiler_params=cparams,
            cost_estimate=pl.CostEstimate(
                flops=matmul_flops,
                transcendentals=0,
                bytes_accessed=4 * batch * (in_dim + out_dim) + param_bytes),
        )(x, w1, b1_2d, w2, b2_2d)
        return pred

    # Training path: fused forward + CE partial sums in a single pallas_call.
    y_col = y.astype(jnp.int32).reshape(batch, 1)
    kernel = functools.partial(_mlp_fwd_loss_kernel, true_rows=batch)
    pred, loss_parts = pl.pallas_call(
        kernel,
        out_shape=(jax.ShapeDtypeStruct((batch, out_dim), jnp.float32),
                   jax.ShapeDtypeStruct((1, _LANES * num_tiles), jnp.float32)),
        grid=grid,
        in_specs=[x_spec] + w_specs + [pl.BlockSpec((tb, 1), lambda i: (i, 0))],
        out_specs=(pred_spec,
                   pl.BlockSpec((1, _LANES), lambda i: (0, i))),   # lane-dense
        compiler_params=cparams,
        cost_estimate=pl.CostEstimate(
            flops=matmul_flops + 8 * batch * out_dim,
            transcendentals=batch * (out_dim + 1),
            bytes_accessed=(4 * batch * (in_dim + out_dim + 1) + param_bytes
                            + 4 * _LANES * num_tiles)),
    )(x, w1, b1_2d, w2, b2_2d, y_col)
    # Mean over the true batch size: tiny reduction over num_tiles partial sums.
    loss = jnp.sum(loss_parts.reshape(num_tiles, _LANES)[:, 0]) / batch
    return pred, loss


def init_params(key, in_dim, out_dim, hidden=128):
    """Deterministic init matching nn.Linear shapes (weights kept transposed)."""
    k1, k2, k3, k4 = jax.random.split(key, 4)
    lim1 = 1.0 / jnp.sqrt(in_dim)
    lim2 = 1.0 / jnp.sqrt(hidden)
    return {
        "w1": jax.random.uniform(k1, (in_dim, hidden), jnp.float32, -lim1, lim1),
        "b1": jax.random.uniform(k2, (hidden,), jnp.float32, -lim1, lim1),
        "w2": jax.random.uniform(k3, (hidden, out_dim), jnp.float32, -lim2, lim2),
        "b2": jax.random.uniform(k4, (out_dim,), jnp.float32, -lim2, lim2),
    }


# ------------------------------- main ---------------------------------------


if __name__ == "__main__":
    key = jax.random.PRNGKey(0)
    k_param, k_x, k_y = jax.random.split(key, 3)

    batch, in_dim, out_dim = 8, 32, 16
    params = init_params(k_param, in_dim, out_dim)
    x = jax.random.normal(k_x, (batch, in_dim), jnp.float32)
    y = jax.random.randint(k_y, (batch,), 0, out_dim, jnp.int32)

    # inference path (y=None)
    pred = mlp_apply(x, params)
    pred = jax.block_until_ready(pred)

    # training path (y given) -> (pred, loss), single fused kernel
    pred2, loss = mlp_apply(x, params, y)
    jax.block_until_ready((pred2, loss))

    # sanity-check against pure-JAX reference
    h_ref = jnp.maximum(x @ params["w1"] + params["b1"], 0.0)
    pred_ref = h_ref @ params["w2"] + params["b2"]
    logp = jax.nn.log_softmax(pred_ref, axis=-1)
    loss_ref = -jnp.mean(logp[jnp.arange(batch), y])
    assert jnp.allclose(pred, pred_ref, atol=1e-5, rtol=1e-5)
    assert jnp.allclose(pred2, pred_ref, atol=1e-5, rtol=1e-5)
    assert jnp.allclose(loss, loss_ref, atol=1e-5, rtol=1e-5)

    print("KERNEL_OK")
</pallas_src>

<mosaic_0001>
module attributes {stable_mosaic.version = 11 : i64} {
  func.func @_mlp_fwd_kernel(%arg0: i32, %arg1: memref<8x32xf32, #tpu.memory_space<vmem>>, %arg2: memref<32x128xf32, #tpu.memory_space<vmem>>, %arg3: memref<1x128xf32, #tpu.memory_space<vmem>>, %arg4: memref<128x16xf32, #tpu.memory_space<vmem>>, %arg5: memref<1x16xf32, #tpu.memory_space<vmem>>, %arg6: memref<8x16xf32, #tpu.memory_space<vmem>>) attributes {dimension_semantics = [#tpu.dimension_semantics<parallel>], iteration_bounds = array<i64: 1>, scalar_prefetch = 0 : i64, scratch_operands = 0 : i64, tpu.core_type = #tpu.core_type<tc>, window_params = [{transform_indices = @transform_0, window_bounds = array<i64: 8, 32>}, {pipeline_mode = #tpu.pipeline_mode<synchronous>, transform_indices = @transform_1, window_bounds = array<i64: 32, 128>}, {pipeline_mode = #tpu.pipeline_mode<synchronous>, transform_indices = @transform_2, window_bounds = array<i64: 1, 128>}, {pipeline_mode = #tpu.pipeline_mode<synchronous>, transform_indices = @transform_3, window_bounds = array<i64: 128, 16>}, {pipeline_mode = #tpu.pipeline_mode<synchronous>, transform_indices = @transform_4, window_bounds = array<i64: 1, 16>}, {transform_indices = @transform_5, window_bounds = array<i64: 8, 16>}]} {
    %c0 = arith.constant 0 : index
    %c0_0 = arith.constant 0 : index
    %0 = vector.load %arg1[%c0, %c0_0] : memref<8x32xf32, #tpu.memory_space<vmem>>, vector<8x32xf32>
    %c0_1 = arith.constant 0 : index
    %c0_2 = arith.constant 0 : index
    %1 = vector.load %arg2[%c0_1, %c0_2] : memref<32x128xf32, #tpu.memory_space<vmem>>, vector<32x128xf32>
    %cst = arith.constant dense<0.000000e+00> : vector<8x128xf32>
    %2 = tpu.matmul %0, %1, %cst {dimension_numbers = #tpu.dot_dimension_numbers<[1], [0], [0], [1], [0, 0, 1, 1], [], []>} : vector<8x32xf32>, vector<32x128xf32>, vector<8x128xf32> -> vector<8x128xf32>
    %c0_3 = arith.constant 0 : index
    %c0_4 = arith.constant 0 : index
    %3 = vector.load %arg3[%c0_3, %c0_4] : memref<1x128xf32, #tpu.memory_space<vmem>>, vector<1x128xf32>
    %4 = vector.broadcast %3 : vector<1x128xf32> to vector<8x128xf32>
    %5 = arith.addf %2, %4 : vector<8x128xf32>
    %cst_5 = arith.constant 0.000000e+00 : f32
    %6 = vector.broadcast %cst_5 : f32 to vector<8x128xf32>
    %7 = arith.maximumf %5, %6 : vector<8x128xf32>
    %c0_6 = arith.constant 0 : index
    %c0_7 = arith.constant 0 : index
    %8 = vector.load %arg4[%c0_6, %c0_7] : memref<128x16xf32, #tpu.memory_space<vmem>>, vector<128x16xf32>
    %cst_8 = arith.constant dense<0.000000e+00> : vector<8x16xf32>
    %9 = tpu.matmul %7, %8, %cst_8 {dimension_numbers = #tpu.dot_dimension_numbers<[1], [0], [0], [1], [0, 0, 1, 1], [], []>} : vector<8x128xf32>, vector<128x16xf32>, vector<8x16xf32> -> vector<8x16xf32>
    %c0_9 = arith.constant 0 : index
    %c0_10 = arith.constant 0 : index
    %10 = vector.load %arg5[%c0_9, %c0_10] : memref<1x16xf32, #tpu.memory_space<vmem>>, vector<1x16xf32>
    %11 = vector.broadcast %10 : vector<1x16xf32> to vector<8x16xf32>
    %12 = arith.addf %9, %11 : vector<8x16xf32>
    %c0_11 = arith.constant 0 : index
    %c0_12 = arith.constant 0 : index
    %13 = vector.load %arg6[%c0_11, %c0_12] : memref<8x16xf32, #tpu.memory_space<vmem>>, vector<8x16xf32>
    tpu.vector_store %arg6[%c0_11, %c0_12], %12 {strides = array<i32>} : memref<8x16xf32, #tpu.memory_space<vmem>>, vector<8x16xf32>,
    return
  }
  func.func @transform_0(%arg0: i32) -> (i32, i32) {
    %c0_i32 = arith.constant 0 : i32
    %c0_i32_0 = arith.constant 0 : i32
    return %arg0, %c0_i32 : i32, i32
  }
  func.func @transform_1(%arg0: i32) -> (i32, i32) {
    %c0_i32 = arith.constant 0 : i32
    %c0_i32_0 = arith.constant 0 : i32
    %c0_i32_1 = arith.constant 0 : i32
    return %c0_i32, %c0_i32_0 : i32, i32
  }
  func.func @transform_2(%arg0: i32) -> (i32, i32) {
    %c0_i32 = arith.constant 0 : i32
    %c0_i32_0 = arith.constant 0 : i32
    %c0_i32_1 = arith.constant 0 : i32
    return %c0_i32, %c0_i32_0 : i32, i32
  }
  func.func @transform_3(%arg0: i32) -> (i32, i32) {
    %c0_i32 = arith.constant 0 : i32
    %c0_i32_0 = arith.constant 0 : i32
    %c0_i32_1 = arith.constant 0 : i32
    return %c0_i32, %c0_i32_0 : i32, i32
  }
  func.func @transform_4(%arg0: i32) -> (i32, i32) {
    %c0_i32 = arith.constant 0 : i32
    %c0_i32_0 = arith.constant 0 : i32
    %c0_i32_1 = arith.constant 0 : i32
    return %c0_i32, %c0_i32_0 : i32, i32
  }
  func.func @transform_5(%arg0: i32) -> (i32, i32) {
    %c0_i32 = arith.constant 0 : i32
    %c0_i32_0 = arith.constant 0 : i32
    return %arg0, %c0_i32 : i32, i32
  }
}

</mosaic_0001>

<bundles_post_ra>
// kernel: mlp_apply.1
= control target key start
LH: loop header
LB: loop body
LE: loop exit
PB: predicated region body
PF: predicated region fallthrough
CT: control target
= control target key end

     0   :  { %v346_v3 = vmov 0.0|0.0   ;;  %vm347_vm0 = vmmov 0   ;;  %v348_v6 = vmov 0.0   ;;  %s461_s0 = inlined_call_operand.vmem [shape: f32[8,32], index: 0, kind: input, shape index: {}]   ;;  %s462_s1 = inlined_call_operand.vmem [shape: f32[32,128], index: 1, kind: input, shape index: {}]   ;;  %s463_s2 = inlined_call_operand.vmem [shape: f32[1,128], index: 2, kind: input, shape index: {}]   ;;  %s464_s3 = inlined_call_operand.vmem [shape: f32[128,16], index: 3, kind: input, shape index: {}]   ;;  %s465_s4 = inlined_call_operand.vmem [shape: f32[1,16], index: 4, kind: input, shape index: {}]   ;;  %s466_s5 = inlined_call_operand.hbm [shape: f32[8,16], index: 5, kind: output, shape index: {}]  }
   0x1   :  { %v22_v0 = vld [vmem:[%s462_s1] sm:$0xff]  ;;  %v23_v1 = vld [vmem:[%s462_s1 + $0x8] sm:$0xff]  ;;  %v24_v2 = vld [vmem:[%s462_s1 + $0x10] sm:$0xff]  ;;  %288 = vmatprep.subr.bf16.mxu0 %v346_v3  ;;  %250 = vmatprep.mubr.msk.f32.mxu0 %vm347_vm0, %v348_v6 }
   0x2   :  { %v289_v4 = vpack.c.bf16 %v23_v1, %v22_v0  ;;  %v25_v5 = vld [vmem:[%s462_s1 + $0x18] sm:$0xff]  ;;  %v108_v7 = vld [vmem:[%s464_s3] sm:$0xff]  ;;  %294 = vmatprep.subr.bf16.mxu1 %v346_v3  ;;  %v109_v8 = vld [vmem:[%s464_s3 + $0x8] sm:$0xff]  ;;  %285 = vmatprep.mubr.msk.f32.mxu1 %vm347_vm0, %v348_v6 }
   0x3   :  { %v110_v9 = vld [vmem:[%s464_s3 + $0x10] sm:$0xff]  ;;  %v111_v10 = vld [vmem:[%s464_s3 + $0x18] sm:$0xff]  ;;  %v292_v11 = vpack.c.bf16 %v25_v5, %v24_v2  ;;  %v295_v12 = vpack.c.bf16 %v109_v8, %v108_v7  ;;  %v112_v14 = vld [vmem:[%s464_s3 + $0x20] sm:$0xff] }
   0x4   :  { %290 = vmatpush3.bf16.msra.mxu0 %v289_v4  ;;  %v298_v13 = vpack.c.bf16 %v111_v10, %v110_v9  ;;  %v113_v15 = vld [vmem:[%s464_s3 + $0x28] sm:$0xff] }
   0x5   :  { %291 = vmatprep.subr.bf16.mxu0 %v346_v3  ;;  %296 = vmatpush3.bf16.msra.mxu1 %v295_v12 }
   0x6   :  { %297 = vmatprep.subr.bf16.mxu1 %v346_v3 }
   0x7   :  { %10 = vsyncpa [#allocation3], 0  ;;  %v21_v16 = vld [vmem:[%s461_s0] sm:$0xff]  ;;  %vm33_vm1 = vcmask 261120   ;;  %v301_v17 = vpack.c.bf16 %v113_v15, %v112_v14  ;;  %v114_v18 = vld [vmem:[%s464_s3 + $0x30] sm:$0xff]  ;;  %s349_s11 = smov [#allocation2]  }
   0x8   :  { %293 = vmatpush3.bf16.msra.mxu0 %v292_v11  ;;  %v115_v19 = vld [vmem:[%s464_s3 + $0x38] sm:$0xff]  ;;  %v116_v21 = vld [vmem:[%s464_s3 + $0x40] sm:$0xff]  ;;  %v117_v22 = vld [vmem:[%s464_s3 + $0x48] sm:$0xff]  ;;  %s209_s12 = sshll.u32 %s349_s11, 4  ;;  %vm201_vm2 = vcmask 130048   ;;  %s210_s12 = int_to_ptr.vmem [resolvable:$true] %s209_s12 }
   0x9   :  { %299 = vmatpush3.bf16.msra.mxu1 %v298_v13  ;;  %v304_v20 = vpack.c.bf16 %v115_v19, %v114_v18  ;;  %v307_v23 = vpack.c.bf16 %v117_v22, %v116_v21  ;;  %v118_v24 = vld [vmem:[%s464_s3 + $0x50] sm:$0xff]  ;;  %v119_v25 = vld [vmem:[%s464_s3 + $0x58] sm:$0xff]  ;;  %v120_v27 = vld [vmem:[%s464_s3 + $0x60] sm:$0xff]  ;;  %p327_p1 = scmp.lt.s32.totalorder %s210_s12, %s210_s12 }
   0xa   :  { %300 = vmatprep.subr.bf16.mxu1 %v346_v3  ;;  %v310_v26 = vpack.c.bf16 %v119_v25, %v118_v24  ;;  %v121_v28 = vld [vmem:[%s464_s3 + $0x68] sm:$0xff]  ;;  %v122_v30 = vld [vmem:[%s464_s3 + $0x70] sm:$0xff]  ;;  %v123_v31 = vld [vmem:[%s464_s3 + $0x78] sm:$0xff]  ;;  %s322_s3 = scalar_lea.vmem %s210_s12, 128 }
   0xb   :  { %251 = vmatmul.mubr.msk.f32.vlgmr.msra.gmra.mrb[0].mxu0 %vm33_vm1, %v21_v16  ;;  %v313_v29 = vpack.c.bf16 %v121_v28, %v120_v27  ;;  %v316_v32 = vpack.c.bf16 %v123_v31, %v122_v30  ;;  %v217_v33 = vld [vmem:[%s463_s2] ss:$0 sm:$0xff]  ;;  %p323_p0 = scmp.ne.s32.totalorder %s210_s12, %s322_s3  ;;  %p328_p2 = scmp.lt.s32.totalorder %s322_s3, %s322_s3 }
   0xc   :  { %v219_v38 = vld [vmem:[%s465_s4] ss:$0 sm:$0xff] }
   0xd   :  { %302 = vmatpush3.bf16.msra.mxu1 %v301_v17  ;;  %p329_p3 = por %p328_p2, %p327_p1 }
   0xe   :  { %303 = vmatprep.subr.bf16.mxu1 %v346_v3 }
   0xf   :  { %p330_p4 = pnand %p329_p3, %p323_p0 }
  0x11   :  { %305 = vmatpush3.bf16.msra.mxu1 %v304_v20 }
  0x12   :  { %306 = vmatprep.subr.bf16.mxu1 %v346_v3 }
  0x15   :  { %308 = vmatpush3.bf16.msra.mxu1 %v307_v23 }
  0x16   :  { %309 = vmatprep.subr.bf16.mxu1 %v346_v3 }
  0x19   :  { %311 = vmatpush3.bf16.msra.mxu1 %v310_v26 }
  0x1a   :  { %312 = vmatprep.subr.bf16.mxu1 %v346_v3 }
  0x1d   :  { %314 = vmatpush3.bf16.msra.mxu1 %v313_v29 }
  0x1e   :  { %315 = vmatprep.subr.bf16.mxu1 %v346_v3 }
  0x21   :  { %317 = vmatpush3.bf16.msra.mxu1 %v316_v32 }
  0xde   :  { %v103_v34 = vpop.f32.mrb[0].mxu0 }
  0xdf   :  { %v104_v35 = vadd.f32 %v217_v33, %v103_v34  ;;  %v252_v36 = vpop.f32.mrb[1].mxu0 }
  0xe1   :  { %v107_v37 = vmax.f32 %v104_v35, 0.0 }
  0xe3   :  { %286 = vmatmul.mubr.f32.vlgmr.msra.gmra.mrb[0].mxu1 %v107_v37 }
 0x1b6   :  { %v197_v39 = vpop.f32.mrb[0].mxu1 }
 0x1b7   :  { %v198_v40 = vadd.f32 %v219_v38, %v197_v39  ;;  %v287_v41 = vpop.f32.mrb[1].mxu1 }
 0x1b9   :  { %202 = vst.msk [vmem:[#allocation2] sm:$0xff] %vm201_vm2, %v198_v40 }
 0x1ba   :  { %333 = shalt.err (!%p330_p4)
}
 0x1bb   :  { %s334_s14 = scalar_lea.hbm %s466_s5, 128 }
 0x1bc   :  { %p335_p5 = scmp.ne.s32.totalorder %s466_s5, %s334_s14  ;;  %p338_p6 = scmp.lt.u32.totalorder %s334_s14, %s466_s5 }
 0x1be   :  { %p340_p7 = pnand %p338_p6, %p335_p5 }
 0x1c0   :  { %343 = shalt.err (!%p340_p7)
}
 0x1c1   :  { %212 = dma.vmem_to_hbm [thread:$0]  %s210_s12, 128, %s466_s5, [#allocation3]  }
 0x1c2   :  { %344 = dma.done.wait [#allocation3], 128  }
 0x1c3   :  { %345 = vsyncadd [#allocation3], 4294967168 }
 0x1c4   :  { %216 = vsyncpa [#allocation3], 1 }

</bundles_post_ra>
